<compile_context>
chip_gen: v7x
topology: tpu7x:2x2x1
jax: 0.10.0
libtpu: 0.0.40
codegen_flags: <defaults>
</compile_context>

<pallas_src>
import jax
import jax.numpy as jnp
from jax.experimental import pallas as pl
from jax.experimental.pallas import tpu as pltpu


def logreg_kernel(x_ref, w_ref, b_ref, o_ref):
    # x_ref: (TB, F*D) VMEM   w_ref: (F*D, F) VMEM (block-diagonal)
    # b_ref: (1,) SMEM        o_ref: (TB, F) VMEM
    b = b_ref[0]  # scalar bias from SMEM (no VPU broadcast tile)
    z = jnp.dot(x_ref[...], w_ref[...], preferred_element_type=jnp.float32) + b
    # sigmoid: exp + reciprocal both take the EUP slot, hidden under the HBM stream.
    e = jnp.exp(-z)
    o_ref[...] = pl.reciprocal(1.0 + e, approx=False).astype(o_ref.dtype)


def _fold_factor(B, D):
    """Largest power-of-two F (with F*D | 128) that also divides B; 1 if no fold."""
    if D <= 0 or 128 % D != 0:
        return 1
    f = 128 // D
    while f > 1 and B % f != 0:
        f //= 2
    return max(f, 1)


def _pick_batch_tile(B_fold, lanes, F, itemsize=4,
                     pipeline_budget_bytes=16 * 1024 * 1024):
    """Rows of folded x per grid step, sized by lane-padding-aware VMEM cost.

    Per folded row: double-buffered x tile costs 2 * round_up(lanes,128) * itemsize
    and the double-buffered out tile costs 2 * round_up(F,128) * itemsize (the F-wide
    output still pads to a full 128-lane row in VMEM).
    """
    lanes_pad = ((max(lanes, 1) + 127) // 128) * 128
    out_pad = ((max(F, 1) + 127) // 128) * 128
    bytes_per_row = 2 * (lanes_pad + out_pad) * itemsize
    max_tb = max(8, pipeline_budget_bytes // bytes_per_row)
    if B_fold <= max_tb:
        return max(B_fold, 1)            # single tile == full array (always legal)
    return max(8, (max_tb // 8) * 8)     # 8-aligned tiles; ragged last tile is fine


def logistic_regression_forward(x, w, b, *, tile_rows=None):
    """x: (B, D) f32, w: (D, 1) f32, b: (1,) f32 -> (B, 1) f32 = sigmoid(x @ w + b)."""
    B, D = x.shape
    F = _fold_factor(B, D)
    lanes = F * D
    B_fold = B // F

    # Free, contiguous reshape: fold F consecutive batch rows into the lane dim.
    x_fold = x.reshape(B_fold, lanes)
    # Block-diagonal weight: rows i*D:(i+1)*D of column i hold w.
    w_fold = jnp.kron(jnp.eye(F, dtype=w.dtype), w) if F > 1 else w

    tb = tile_rows if tile_rows is not None else _pick_batch_tile(
        B_fold, lanes, F, x.dtype.itemsize)
    nb = pl.cdiv(B_fold, tb)

    out = pl.pallas_call(
        logreg_kernel,
        out_shape=jax.ShapeDtypeStruct((B_fold, F), jnp.float32),
        grid_spec=pltpu.PrefetchScalarGridSpec(
            num_scalar_prefetch=0,
            grid=(nb,),
            in_specs=[
                pl.BlockSpec((tb, lanes), lambda i: (i, 0)),            # streamed x tiles
                pl.BlockSpec((lanes, F), lambda i: (0, 0)),             # resident block-diag w
                pl.BlockSpec(memory_space=pltpu.MemorySpace.SMEM),      # scalar bias
            ],
            out_specs=pl.BlockSpec((tb, F), lambda i: (i, 0)),
        ),
        compiler_params=pltpu.CompilerParams(
            # Independent batch tiles; safe on single-TC v5e/v6e, shardable on v7x.
            dimension_semantics=("parallel",),
            # Above v5e's 16 MiB scoped default, within v7x's 64 MiB physical VMEM.
            vmem_limit_bytes=32 * 1024 * 1024,
        ),
    )(x_fold, w_fold, b)
    # (B_fold, F) -> (B, 1): row r*F + j of the output is out[r, j] (contiguous reshape).
    return out.reshape(B, 1)


def reference_forward(x, w, b):
    return jax.nn.sigmoid(x @ w + b)


if __name__ == "__main__":
    key = jax.random.PRNGKey(0)
    k_x, k_w, k_b, k_x2 = jax.random.split(key, 4)

    B, D = 8, 32  # batch=8, input_size=32 -> nn.Linear(32, 1)

    # Deterministic init mimicking nn.Linear default: U(-1/sqrt(D), 1/sqrt(D)).
    bound = 1.0 / jnp.sqrt(jnp.float32(D))
    w = jax.random.uniform(k_w, (D, 1), jnp.float32, -bound, bound)
    b = jax.random.uniform(k_b, (1,), jnp.float32, -bound, bound)
    x = jax.random.normal(k_x, (B, D), jnp.float32)

    out = jax.block_until_ready(logistic_regression_forward(x, w, b))
    ref = reference_forward(x, w, b)
    assert out.shape == (B, 1)
    assert jnp.allclose(out, ref, atol=1e-5, rtol=1e-5), float(jnp.max(jnp.abs(out - ref)))

    # Exercise the multi-tile grid + ragged (un-padded) last tile path.
    B2 = 200
    x2 = jax.random.normal(k_x2, (B2, D), jnp.float32)
    out2 = jax.block_until_ready(logistic_regression_forward(x2, w, b, tile_rows=16))
    ref2 = reference_forward(x2, w, b)
    assert out2.shape == (B2, 1)
    assert jnp.allclose(out2, ref2, atol=1e-5, rtol=1e-5), float(jnp.max(jnp.abs(out2 - ref2)))

    print("KERNEL_OK")
</pallas_src>

<mosaic_0001>
module attributes {stable_mosaic.version = 11 : i64} {
  func.func @logreg_kernel(%arg0: i32, %arg1: memref<2x128xf32, #tpu.memory_space<vmem>>, %arg2: memref<128x4xf32, #tpu.memory_space<vmem>>, %arg3: memref<1xf32, #tpu.memory_space<smem>>, %arg4: memref<2x4xf32, #tpu.memory_space<vmem>>) attributes {dimension_semantics = [#tpu.dimension_semantics<parallel>], iteration_bounds = array<i64: 1>, scalar_prefetch = 0 : i64, scratch_operands = 0 : i64, tpu.core_type = #tpu.core_type<tc>, window_params = [{transform_indices = @transform_0, window_bounds = array<i64: 2, 128>}, {pipeline_mode = #tpu.pipeline_mode<synchronous>, transform_indices = @transform_1, window_bounds = array<i64: 128, 4>}, {transform_indices = @transform_2, window_bounds = array<i64: 1>}, {transform_indices = @transform_3, window_bounds = array<i64: 2, 4>}]} {
    %c0 = arith.constant 0 : index
    %0 = memref.load %arg3[%c0] : memref<1xf32, #tpu.memory_space<smem>>
    %c0_0 = arith.constant 0 : index
    %c0_1 = arith.constant 0 : index
    %1 = vector.load %arg1[%c0_0, %c0_1] : memref<2x128xf32, #tpu.memory_space<vmem>>, vector<2x128xf32>
    %c0_2 = arith.constant 0 : index
    %c0_3 = arith.constant 0 : index
    %2 = vector.load %arg2[%c0_2, %c0_3] : memref<128x4xf32, #tpu.memory_space<vmem>>, vector<128x4xf32>
    %cst = arith.constant dense<0.000000e+00> : vector<2x4xf32>
    %3 = tpu.matmul %1, %2, %cst {dimension_numbers = #tpu.dot_dimension_numbers<[1], [0], [0], [1], [0, 0, 1, 1], [], []>} : vector<2x128xf32>, vector<128x4xf32>, vector<2x4xf32> -> vector<2x4xf32>
    %4 = vector.broadcast %0 : f32 to vector<2x4xf32>
    %5 = arith.addf %3, %4 : vector<2x4xf32>
    %cst_4 = arith.constant 0.000000e+00 : f32
    %6 = vector.broadcast %cst_4 : f32 to vector<2x4xf32>
    %7 = arith.subf %6, %5 : vector<2x4xf32>
    %8 = math.exp %7 : vector<2x4xf32>
    %cst_5 = arith.constant 1.000000e+00 : f32
    %9 = vector.broadcast %cst_5 : f32 to vector<2x4xf32>
    %10 = arith.addf %9, %8 : vector<2x4xf32>
    %11 = tpu.reciprocal %10 : vector<2x4xf32> -> vector<2x4xf32>
    %c0_6 = arith.constant 0 : index
    %c0_7 = arith.constant 0 : index
    %12 = vector.load %arg4[%c0_6, %c0_7] : memref<2x4xf32, #tpu.memory_space<vmem>>, vector<2x4xf32>
    tpu.vector_store %arg4[%c0_6, %c0_7], %11 {strides = array<i32>} : memref<2x4xf32, #tpu.memory_space<vmem>>, vector<2x4xf32>,
    return
  }
  func.func @transform_0(%arg0: i32) -> (i32, i32) {
    %c0_i32 = arith.constant 0 : i32
    %c0_i32_0 = arith.constant 0 : i32
    return %arg0, %c0_i32 : i32, i32
  }
  func.func @transform_1(%arg0: i32) -> (i32, i32) {
    %c0_i32 = arith.constant 0 : i32
    %c0_i32_0 = arith.constant 0 : i32
    %c0_i32_1 = arith.constant 0 : i32
    return %c0_i32, %c0_i32_0 : i32, i32
  }
  func.func @transform_2(%arg0: i32) -> i32 {
    %c0_i32 = arith.constant 0 : i32
    %c0_i32_0 = arith.constant 0 : i32
    return %c0_i32 : i32
  }
  func.func @transform_3(%arg0: i32) -> (i32, i32) {
    %c0_i32 = arith.constant 0 : i32
    %c0_i32_0 = arith.constant 0 : i32
    return %arg0, %c0_i32 : i32, i32
  }
}

</mosaic_0001>

<bundles_post_ra>
// kernel: tpu_custom_call.1
= control target key start
LH: loop header
LB: loop body
LE: loop exit
PB: predicated region body
PF: predicated region fallthrough
CT: control target
= control target key end

     0   :  { %v234_v3 = vmov 0.0|0.0   ;;  %vm235_vm0 = vmmov 0   ;;  %v236_v6 = vmov 0.0   ;;  %s324_s0 = inlined_call_operand.vmem [shape: f32[2,128], index: 0, kind: input, shape index: {}]   ;;  %s325_s1 = inlined_call_operand.vmem [shape: f32[128,4], index: 1, kind: input, shape index: {}]   ;;  %s326_s2 = inlined_call_operand.<no memory space> [shape: f32[1], index: 2, kind: input, shape index: {}]   ;;  %s327_s3 = inlined_call_operand.hbm [shape: f32[2,4], index: 3, kind: output, shape index: {}]  }
   0x1   :  { %v18_v0 = vld [vmem:[%s325_s1] sm:$0xff]  ;;  %v19_v1 = vld [vmem:[%s325_s1 + $0x8] sm:$0xff]  ;;  %v20_v2 = vld [vmem:[%s325_s1 + $0x10] sm:$0xff]  ;;  %178 = vmatprep.subr.bf16.mxu0 %v234_v3  ;;  %175 = vmatprep.mubr.msk.f32.mxu0 %vm235_vm0, %v236_v6 }
   0x2   :  { %v179_v4 = vpack.c.bf16 %v19_v1, %v18_v0  ;;  %v21_v5 = vld [vmem:[%s325_s1 + $0x18] sm:$0xff]  ;;  %v22_v8 = vld [vmem:[%s325_s1 + $0x20] sm:$0xff]  ;;  %v23_v9 = vld [vmem:[%s325_s1 + $0x28] sm:$0xff] }
   0x3   :  { %v182_v7 = vpack.c.bf16 %v21_v5, %v20_v2 }
   0x4   :  { %180 = vmatpush3.bf16.msra.mxu0 %v179_v4 }
   0x5   :  { %181 = vmatprep.subr.bf16.mxu0 %v234_v3 }
   0x6   :  { %9 = vsyncpa [#allocation4], 0  ;;  %v185_v10 = vpack.c.bf16 %v23_v9, %v22_v8  ;;  %v24_v11 = vld [vmem:[%s325_s1 + $0x30] sm:$0xff]  ;;  %v25_v12 = vld [vmem:[%s325_s1 + $0x38] sm:$0xff]  ;;  %v34_v27 = vstv %s326_s2  ;;  %vm110_vm1 = vcmask 25600  }
   0x7   :  { %v188_v13 = vpack.c.bf16 %v25_v12, %v24_v11  ;;  %v26_v14 = vld [vmem:[%s325_s1 + $0x40] sm:$0xff]  ;;  %v27_v15 = vld [vmem:[%s325_s1 + $0x48] sm:$0xff]  ;;  %v28_v17 = vld [vmem:[%s325_s1 + $0x50] sm:$0xff] }
   0x8   :  { %183 = vmatpush3.bf16.msra.mxu0 %v182_v7  ;;  %v191_v16 = vpack.c.bf16 %v27_v15, %v26_v14  ;;  %v29_v18 = vld [vmem:[%s325_s1 + $0x58] sm:$0xff]  ;;  %v30_v20 = vld [vmem:[%s325_s1 + $0x60] sm:$0xff]  ;;  %v31_v21 = vld [vmem:[%s325_s1 + $0x68] sm:$0xff] }
   0x9   :  { %184 = vmatprep.subr.bf16.mxu0 %v234_v3  ;;  %v194_v19 = vpack.c.bf16 %v29_v18, %v28_v17  ;;  %v197_v22 = vpack.c.bf16 %v31_v21, %v30_v20  ;;  %v32_v23 = vld [vmem:[%s325_s1 + $0x70] sm:$0xff]  ;;  %v33_v24 = vld [vmem:[%s325_s1 + $0x78] sm:$0xff]  ;;  %v17_v26 = vld [vmem:[%s324_s0] sm:$0x3]  ;;  %s237_s1 = smov [#allocation3]  }
   0xa   :  { %v200_v25 = vpack.c.bf16 %v33_v24, %v32_v23  ;;  %s118_s21 = sshll.u32 %s237_s1, 4  ;;  %s119_s21 = int_to_ptr.vmem [resolvable:$true] %s118_s21 }
   0xb   :  { %s210_s0 = scalar_lea.vmem %s119_s21, 32  ;;  %p215_p1 = scmp.lt.s32.totalorder %s119_s21, %s119_s21 }
   0xc   :  { %186 = vmatpush3.bf16.msra.mxu0 %v185_v10  ;;  %p211_p0 = scmp.ne.s32.totalorder %s119_s21, %s210_s0  ;;  %p216_p2 = scmp.lt.s32.totalorder %s210_s0, %s210_s0 }
   0xd   :  { %187 = vmatprep.subr.bf16.mxu0 %v234_v3 }
   0xe   :  { %p217_p3 = por %p216_p2, %p215_p1 }
  0x10   :  { %189 = vmatpush3.bf16.msra.mxu0 %v188_v13  ;;  %p218_p4 = pnand %p217_p3, %p211_p0 }
  0x11   :  { %190 = vmatprep.subr.bf16.mxu0 %v234_v3 }
  0x14   :  { %192 = vmatpush3.bf16.msra.mxu0 %v191_v16 }
  0x15   :  { %193 = vmatprep.subr.bf16.mxu0 %v234_v3 }
  0x18   :  { %195 = vmatpush3.bf16.msra.mxu0 %v194_v19 }
  0x19   :  { %196 = vmatprep.subr.bf16.mxu0 %v234_v3 }
  0x1c   :  { %198 = vmatpush3.bf16.msra.mxu0 %v197_v22 }
  0x1d   :  { %199 = vmatprep.subr.bf16.mxu0 %v234_v3 }
  0x20   :  { %201 = vmatpush3.bf16.msra.mxu0 %v200_v25 }
  0x23   :  { %176 = vmatmul.mubr.f32.vlgmr.msra.gmra.mrb[0].mxu0 %v17_v26 }
  0xf6   :  { %v101_v28 = vpop.f32.mrb[0].mxu0 }
  0xf7   :  { %v102_v29 = vadd.f32 %v101_v28, %v34_v27  ;;  %v177_v30 = vpop.f32.mrb[1].mxu0 }
  0xf9   :  { %v105_v31 = vsub.f32 0.0, %v102_v29 }
  0xfb   :  { %v106_v32 = vmul.f32 1.442695, %v105_v31 }
  0xfd   :  { %206 = vpow2.f32 %v106_v32 }
 0x107   :  { %v207_v33 = vpop.eup %206 }
 0x108   :  { %v108_v34 = vadd.f32 1.0, %v207_v33 }
 0x10a   :  { %208 = vrcp.f32 %v108_v34 }
 0x114   :  { %v209_v35 = vpop.eup %208 }
 0x115   :  { %111 = vst.msk [vmem:[#allocation3] sm:$0x3] %vm110_vm1, %v209_v35 }
 0x116   :  { %221 = shalt.err (!%p218_p4)
}
 0x117   :  { %s222_s23 = scalar_lea.hbm %s327_s3, 32 }
 0x118   :  { %p223_p5 = scmp.ne.s32.totalorder %s327_s3, %s222_s23  ;;  %p226_p6 = scmp.lt.u32.totalorder %s222_s23, %s327_s3 }
 0x11a   :  { %p228_p7 = pnand %p226_p6, %p223_p5 }
 0x11c   :  { %231 = shalt.err (!%p228_p7)
}
 0x11d   :  { %121 = dma.vmem_to_hbm [thread:$0]  %s119_s21, 32, %s327_s3, [#allocation4]  }
 0x11e   :  { %232 = dma.done.wait [#allocation4], 32  }
 0x11f   :  { %233 = vsyncadd [#allocation4], 4294967264 }
 0x120   :  { %125 = vsyncpa [#allocation4], 1 }

</bundles_post_ra>
